<compile_context>
chip_gen: v5e
topology: v5e:2x2
jax: 0.10.0
libtpu: 0.0.40
codegen_flags: <defaults>
</compile_context>

<pallas_src>
import functools

import jax
import jax.numpy as jnp
from jax.experimental import pallas as pl
from jax.experimental.pallas import tpu as pltpu


def _round_up(x, m):
    return (x + m - 1) // m * m


def _grpo_policy_kernel(x_ref,
                        w1_ref, b1_ref,
                        w2_ref, b2_ref,
                        w3_ref, b3_ref,
                        w4_ref, b4_ref,
                        out_ref):
    """Fused MLP forward for one batch tile: 3x (Linear + ReLU) + Linear."""
    # In-kernel f32 -> bf16 cast: cheap VPU work hidden under the MXU, avoids a
    # separate whole-slab cast pass in the wrapper.
    x = x_ref[...].astype(jnp.bfloat16)                      # [TB, obs_dim]

    # Layer 1: Linear(obs_dim, hidden) + ReLU
    h = jnp.dot(x, w1_ref[...], preferred_element_type=jnp.float32) + b1_ref[...]
    h = jnp.maximum(h, 0.0).astype(jnp.bfloat16)

    # Layer 2: Linear(hidden, hidden) + ReLU
    h = jnp.dot(h, w2_ref[...], preferred_element_type=jnp.float32) + b2_ref[...]
    h = jnp.maximum(h, 0.0).astype(jnp.bfloat16)

    # Layer 3: Linear(hidden, hidden) + ReLU
    h = jnp.dot(h, w3_ref[...], preferred_element_type=jnp.float32) + b3_ref[...]
    h = jnp.maximum(h, 0.0).astype(jnp.bfloat16)

    # Layer 4: Linear(hidden, action_dim) -> logits (no activation), f32 out.
    logits = jnp.dot(h, w4_ref[...], preferred_element_type=jnp.float32) + b4_ref[...]
    out_ref[...] = logits.astype(out_ref.dtype)


def _resident_spec(arr):
    """Whole-array block with a constant index_map: the weight/bias tile is
    fetched from HBM once and stays VMEM-resident across all batch tiles.
    (Closure over `arr` is evaluated per call, so no late-binding issue.)"""
    nd = arr.ndim
    return pl.BlockSpec(arr.shape, lambda i: (0,) * nd)


@functools.partial(jax.jit, static_argnames=("block_b",))
def grpo_policy_forward(obs, params, *, block_b=4096):
    """GRPOPolicy forward (returns logits) via one pallas_call.

    obs:    [B, obs_dim] float32
    params: dict with w1..w4 (in, out) bf16 and b1..b4 (1, out) f32 arrays.
    block_b: batch tile size. Keep it a multiple of 16 (bf16 sublane packing);
             2048-8192 recommended for large rollout batches.
    """
    B, obs_dim = obs.shape
    hidden_dim = params["w1"].shape[1]
    action_dim = params["w4"].shape[1]

    # ---- Batch tiling: big tiles so the ~0.35 us/step pipeline overhead is
    # negligible vs. MXU work and resident weights are reused across many rows.
    tb = min(_round_up(block_b, 16), _round_up(B, 16))
    b_pad = _round_up(B, tb)
    x = obs
    if b_pad != B:
        # Ragged tail: pad up to a full tile (garbage rows sliced off below).
        # TODO(synk): replace with in-kernel tail masking to avoid the pad copy
        # and the wasted rows when B is far from a multiple of tb.
        x = jnp.pad(x, ((0, b_pad - B), (0, 0)))

    grid = (b_pad // tb,)

    in_specs = [
        pl.BlockSpec((tb, obs_dim), lambda i: (i, 0)),   # batch-tiled observations
        _resident_spec(params["w1"]), _resident_spec(params["b1"]),
        _resident_spec(params["w2"]), _resident_spec(params["b2"]),
        _resident_spec(params["w3"]), _resident_spec(params["b3"]),
        _resident_spec(params["w4"]), _resident_spec(params["b4"]),
    ]

    # Advisory cost estimate so XLA schedules the kernel sensibly against
    # surrounding rollout ops (sampling, env step, etc.).
    flops = 2 * b_pad * (obs_dim * hidden_dim
                         + 2 * hidden_dim * hidden_dim
                         + hidden_dim * action_dim)
    weight_bytes = sum(int(v.size) * v.dtype.itemsize for v in params.values())
    bytes_accessed = (b_pad * obs_dim * 4          # obs in (f32)
                      + weight_bytes               # resident params (once)
                      + b_pad * action_dim * 4)    # logits out (f32)
    cost = pl.CostEstimate(flops=flops, transcendentals=0,
                           bytes_accessed=bytes_accessed)

    # NOTE: at hidden_dim=256 the whole working set (resident weights, 2x
    # double-buffered obs/out tiles, f32 intermediates) is ~20 MiB even at
    # tb=4096.  48 MiB headroom covers every generation (v5e default scoped
    # VMEM is only 16 MiB) while staying under v7x's 64 MiB physical VMEM.
    # If hidden_dim is ever scaled up, shrink tb / add a reduction grid axis.
    out = pl.pallas_call(
        _grpo_policy_kernel,
        out_shape=jax.ShapeDtypeStruct((b_pad, action_dim), jnp.float32),
        grid=grid,
        in_specs=in_specs,
        # Last dim == full array dim (action_dim), so this narrow out block is
        # legal; the HBM writeback is 16x smaller than the old 128-lane pad.
        out_specs=pl.BlockSpec((tb, action_dim), lambda i: (i, 0)),
        compiler_params=pltpu.CompilerParams(
            # v7x: batch tiles are independent -> split across the 2 TensorCores.
            dimension_semantics=("parallel",),
            vmem_limit_bytes=48 * 1024 * 1024,
        ),
        cost_estimate=cost,
    )(x,
      params["w1"], params["b1"],
      params["w2"], params["b2"],
      params["w3"], params["b3"],
      params["w4"], params["b4"])

    if b_pad != B:
        out = out[:B]
    return out


def init_grpo_policy_params(key, obs_dim, action_dim, hidden_dim):
    """Deterministic init mimicking torch.nn.Linear's U(-1/sqrt(fan_in), ...).

    Weights are stored in bf16 (native MXU input dtype, half the HBM->VMEM
    traffic); biases stay f32 since they are added after f32 accumulation.
    NOTE: bf16 weights mean logits differ from an fp32 PyTorch module at the
    ~1e-2 level, which is fine for an RL policy's categorical logits.
    """
    dims = [(obs_dim, hidden_dim),
            (hidden_dim, hidden_dim),
            (hidden_dim, hidden_dim),
            (hidden_dim, action_dim)]
    params = {}
    for i, (fan_in, fan_out) in enumerate(dims, start=1):
        key, kw, kb = jax.random.split(key, 3)
        bound = float(fan_in) ** -0.5
        w = jax.random.uniform(kw, (fan_in, fan_out), jnp.float32, -bound, bound)
        b = jax.random.uniform(kb, (1, fan_out), jnp.float32, -bound, bound)
        params[f"w{i}"] = w.astype(jnp.bfloat16)
        params[f"b{i}"] = b
    return params


def _reference_forward(obs, params):
    """Plain-JAX reference with the identical bf16-in / f32-accumulate path."""
    def lin(h, w, b):
        return jnp.dot(h.astype(jnp.bfloat16), w,
                       preferred_element_type=jnp.float32) + b
    h = jnp.maximum(lin(obs, params["w1"], params["b1"]), 0.0)
    h = jnp.maximum(lin(h, params["w2"], params["b2"]), 0.0)
    h = jnp.maximum(lin(h, params["w3"], params["b3"]), 0.0)
    return lin(h, params["w4"], params["b4"])


if __name__ == "__main__":
    # Small shapes consistent with the module: obs -> hidden MLP -> action logits.
    obs_dim = 32
    hidden_dim = 256      # module default; multiple of 256 matches v6e/v7x MXU width
    action_dim = 8

    key = jax.random.PRNGKey(0)
    key, k_obs = jax.random.split(key)
    params = init_grpo_policy_params(key, obs_dim, action_dim, hidden_dim)

    # 1) Tiny batch (single tile).
    batch = 8
    obs = jax.random.normal(k_obs, (batch, obs_dim), dtype=jnp.float32)
    logits = jax.block_until_ready(grpo_policy_forward(obs, params))
    ref = _reference_forward(obs, params)
    assert logits.shape == (batch, action_dim)
    assert jnp.allclose(logits, ref, atol=1e-2, rtol=1e-2), "mismatch vs reference"

    # 2) Multi-tile grid with a ragged tail (block_b=16 -> 3 tiles of 16 rows).
    key, k_obs2 = jax.random.split(key)
    obs2 = jax.random.normal(k_obs2, (40, obs_dim), dtype=jnp.float32)
    logits2 = jax.block_until_ready(grpo_policy_forward(obs2, params, block_b=16))
    ref2 = _reference_forward(obs2, params)
    assert logits2.shape == (40, action_dim)
    assert jnp.allclose(logits2, ref2, atol=1e-2, rtol=1e-2), "mismatch vs reference (tiled)"

    print("KERNEL_OK")
</pallas_src>

<mosaic_0001>
module attributes {stable_mosaic.version = 11 : i64} {
  func.func @_grpo_policy_kernel(%arg0: i32, %arg1: memref<16x32xf32, #tpu.memory_space<vmem>>, %arg2: memref<32x256xbf16, #tpu.memory_space<vmem>>, %arg3: memref<1x256xf32, #tpu.memory_space<vmem>>, %arg4: memref<256x256xbf16, #tpu.memory_space<vmem>>, %arg5: memref<1x256xf32, #tpu.memory_space<vmem>>, %arg6: memref<256x256xbf16, #tpu.memory_space<vmem>>, %arg7: memref<1x256xf32, #tpu.memory_space<vmem>>, %arg8: memref<256x8xbf16, #tpu.memory_space<vmem>>, %arg9: memref<1x8xf32, #tpu.memory_space<vmem>>, %arg10: memref<16x8xf32, #tpu.memory_space<vmem>>) attributes {dimension_semantics = [#tpu.dimension_semantics<parallel>], iteration_bounds = array<i64: 1>, scalar_prefetch = 0 : i64, scratch_operands = 0 : i64, tpu.core_type = #tpu.core_type<tc>, window_params = [{transform_indices = @transform_0, window_bounds = array<i64: 16, 32>}, {pipeline_mode = #tpu.pipeline_mode<synchronous>, transform_indices = @transform_1, window_bounds = array<i64: 32, 256>}, {pipeline_mode = #tpu.pipeline_mode<synchronous>, transform_indices = @transform_2, window_bounds = array<i64: 1, 256>}, {pipeline_mode = #tpu.pipeline_mode<synchronous>, transform_indices = @transform_3, window_bounds = array<i64: 256, 256>}, {pipeline_mode = #tpu.pipeline_mode<synchronous>, transform_indices = @transform_4, window_bounds = array<i64: 1, 256>}, {pipeline_mode = #tpu.pipeline_mode<synchronous>, transform_indices = @transform_5, window_bounds = array<i64: 256, 256>}, {pipeline_mode = #tpu.pipeline_mode<synchronous>, transform_indices = @transform_6, window_bounds = array<i64: 1, 256>}, {pipeline_mode = #tpu.pipeline_mode<synchronous>, transform_indices = @transform_7, window_bounds = array<i64: 256, 8>}, {pipeline_mode = #tpu.pipeline_mode<synchronous>, transform_indices = @transform_8, window_bounds = array<i64: 1, 8>}, {transform_indices = @transform_9, window_bounds = array<i64: 16, 8>}]} {
    %c0 = arith.constant 0 : index
    %c0_0 = arith.constant 0 : index
    %0 = vector.load %arg1[%c0, %c0_0] : memref<16x32xf32, #tpu.memory_space<vmem>>, vector<16x32xf32>
    %1 = arith.truncf %0 : vector<16x32xf32> to vector<16x32xbf16>
    %c0_1 = arith.constant 0 : index
    %c0_2 = arith.constant 0 : index
    %2 = vector.load %arg2[%c0_1, %c0_2] : memref<32x256xbf16, #tpu.memory_space<vmem>>, vector<32x256xbf16>
    %cst = arith.constant dense<0.000000e+00> : vector<16x256xf32>
    %3 = tpu.matmul %1, %2, %cst {dimension_numbers = #tpu.dot_dimension_numbers<[1], [0], [0], [1], [0, 0, 1, 1], [], []>} : vector<16x32xbf16>, vector<32x256xbf16>, vector<16x256xf32> -> vector<16x256xf32>
    %c0_3 = arith.constant 0 : index
    %c0_4 = arith.constant 0 : index
    %4 = vector.load %arg3[%c0_3, %c0_4] : memref<1x256xf32, #tpu.memory_space<vmem>>, vector<1x256xf32>
    %5 = vector.broadcast %4 : vector<1x256xf32> to vector<16x256xf32>
    %6 = arith.addf %3, %5 : vector<16x256xf32>
    %cst_5 = arith.constant 0.000000e+00 : f32
    %7 = vector.broadcast %cst_5 : f32 to vector<16x256xf32>
    %8 = arith.maximumf %6, %7 : vector<16x256xf32>
    %9 = arith.truncf %8 : vector<16x256xf32> to vector<16x256xbf16>
    %c0_6 = arith.constant 0 : index
    %c0_7 = arith.constant 0 : index
    %10 = vector.load %arg4[%c0_6, %c0_7] : memref<256x256xbf16, #tpu.memory_space<vmem>>, vector<256x256xbf16>
    %cst_8 = arith.constant dense<0.000000e+00> : vector<16x256xf32>
    %11 = tpu.matmul %9, %10, %cst_8 {dimension_numbers = #tpu.dot_dimension_numbers<[1], [0], [0], [1], [0, 0, 1, 1], [], []>} : vector<16x256xbf16>, vector<256x256xbf16>, vector<16x256xf32> -> vector<16x256xf32>
    %c0_9 = arith.constant 0 : index
    %c0_10 = arith.constant 0 : index
    %12 = vector.load %arg5[%c0_9, %c0_10] : memref<1x256xf32, #tpu.memory_space<vmem>>, vector<1x256xf32>
    %13 = vector.broadcast %12 : vector<1x256xf32> to vector<16x256xf32>
    %14 = arith.addf %11, %13 : vector<16x256xf32>
    %cst_11 = arith.constant 0.000000e+00 : f32
    %15 = vector.broadcast %cst_11 : f32 to vector<16x256xf32>
    %16 = arith.maximumf %14, %15 : vector<16x256xf32>
    %17 = arith.truncf %16 : vector<16x256xf32> to vector<16x256xbf16>
    %c0_12 = arith.constant 0 : index
    %c0_13 = arith.constant 0 : index
    %18 = vector.load %arg6[%c0_12, %c0_13] : memref<256x256xbf16, #tpu.memory_space<vmem>>, vector<256x256xbf16>
    %cst_14 = arith.constant dense<0.000000e+00> : vector<16x256xf32>
    %19 = tpu.matmul %17, %18, %cst_14 {dimension_numbers = #tpu.dot_dimension_numbers<[1], [0], [0], [1], [0, 0, 1, 1], [], []>} : vector<16x256xbf16>, vector<256x256xbf16>, vector<16x256xf32> -> vector<16x256xf32>
    %c0_15 = arith.constant 0 : index
    %c0_16 = arith.constant 0 : index
    %20 = vector.load %arg7[%c0_15, %c0_16] : memref<1x256xf32, #tpu.memory_space<vmem>>, vector<1x256xf32>
    %21 = vector.broadcast %20 : vector<1x256xf32> to vector<16x256xf32>
    %22 = arith.addf %19, %21 : vector<16x256xf32>
    %cst_17 = arith.constant 0.000000e+00 : f32
    %23 = vector.broadcast %cst_17 : f32 to vector<16x256xf32>
    %24 = arith.maximumf %22, %23 : vector<16x256xf32>
    %25 = arith.truncf %24 : vector<16x256xf32> to vector<16x256xbf16>
    %c0_18 = arith.constant 0 : index
    %c0_19 = arith.constant 0 : index
    %26 = vector.load %arg8[%c0_18, %c0_19] : memref<256x8xbf16, #tpu.memory_space<vmem>>, vector<256x8xbf16>
    %cst_20 = arith.constant dense<0.000000e+00> : vector<16x8xf32>
    %27 = tpu.matmul %25, %26, %cst_20 {dimension_numbers = #tpu.dot_dimension_numbers<[1], [0], [0], [1], [0, 0, 1, 1], [], []>} : vector<16x256xbf16>, vector<256x8xbf16>, vector<16x8xf32> -> vector<16x8xf32>
    %c0_21 = arith.constant 0 : index
    %c0_22 = arith.constant 0 : index
    %28 = vector.load %arg9[%c0_21, %c0_22] : memref<1x8xf32, #tpu.memory_space<vmem>>, vector<1x8xf32>
    %29 = vector.broadcast %28 : vector<1x8xf32> to vector<16x8xf32>
    %30 = arith.addf %27, %29 : vector<16x8xf32>
    %c0_23 = arith.constant 0 : index
    %c0_24 = arith.constant 0 : index
    %31 = vector.load %arg10[%c0_23, %c0_24] : memref<16x8xf32, #tpu.memory_space<vmem>>, vector<16x8xf32>
    tpu.vector_store %arg10[%c0_23, %c0_24], %30 {strides = array<i32>} : memref<16x8xf32, #tpu.memory_space<vmem>>, vector<16x8xf32>,
    return
  }
  func.func @transform_0(%arg0: i32) -> (i32, i32) {
    %c0_i32 = arith.constant 0 : i32
    %c0_i32_0 = arith.constant 0 : i32
    return %arg0, %c0_i32 : i32, i32
  }
  func.func @transform_1(%arg0: i32) -> (i32, i32) {
    %c0_i32 = arith.constant 0 : i32
    %c0_i32_0 = arith.constant 0 : i32
    %c0_i32_1 = arith.constant 0 : i32
    return %c0_i32, %c0_i32_0 : i32, i32
  }
  func.func @transform_2(%arg0: i32) -> (i32, i32) {
    %c0_i32 = arith.constant 0 : i32
    %c0_i32_0 = arith.constant 0 : i32
    %c0_i32_1 = arith.constant 0 : i32
    return %c0_i32, %c0_i32_0 : i32, i32
  }
  func.func @transform_3(%arg0: i32) -> (i32, i32) {
    %c0_i32 = arith.constant 0 : i32
    %c0_i32_0 = arith.constant 0 : i32
    %c0_i32_1 = arith.constant 0 : i32
    return %c0_i32, %c0_i32_0 : i32, i32
  }
  func.func @transform_4(%arg0: i32) -> (i32, i32) {
    %c0_i32 = arith.constant 0 : i32
    %c0_i32_0 = arith.constant 0 : i32
    %c0_i32_1 = arith.constant 0 : i32
    return %c0_i32, %c0_i32_0 : i32, i32
  }
  func.func @transform_5(%arg0: i32) -> (i32, i32) {
    %c0_i32 = arith.constant 0 : i32
    %c0_i32_0 = arith.constant 0 : i32
    %c0_i32_1 = arith.constant 0 : i32
    return %c0_i32, %c0_i32_0 : i32, i32
  }
  func.func @transform_6(%arg0: i32) -> (i32, i32) {
    %c0_i32 = arith.constant 0 : i32
    %c0_i32_0 = arith.constant 0 : i32
    %c0_i32_1 = arith.constant 0 : i32
    return %c0_i32, %c0_i32_0 : i32, i32
  }
  func.func @transform_7(%arg0: i32) -> (i32, i32) {
    %c0_i32 = arith.constant 0 : i32
    %c0_i32_0 = arith.constant 0 : i32
    %c0_i32_1 = arith.constant 0 : i32
    return %c0_i32, %c0_i32_0 : i32, i32
  }
  func.func @transform_8(%arg0: i32) -> (i32, i32) {
    %c0_i32 = arith.constant 0 : i32
    %c0_i32_0 = arith.constant 0 : i32
    %c0_i32_1 = arith.constant 0 : i32
    return %c0_i32, %c0_i32_0 : i32, i32
  }
  func.func @transform_9(%arg0: i32) -> (i32, i32) {
    %c0_i32 = arith.constant 0 : i32
    %c0_i32_0 = arith.constant 0 : i32
    return %arg0, %c0_i32 : i32, i32
  }
}

</mosaic_0001>

<bundles_post_ra>
// kernel: grpo_policy_forward.1
= control target key start
LH: loop header
LB: loop body
LE: loop exit
PB: predicated region body
PF: predicated region fallthrough
CT: control target
= control target key end

     0   :  { %14 = vsyncpa [#allocation3], 0  ;;  %s1462_s0 = inlined_call_operand.vmem [shape: f32[16,32], index: 0, kind: input, shape index: {}]   ;;  %s1463_s1 = inlined_call_operand.vmem [shape: bf16[32,256], index: 1, kind: input, shape index: {}]   ;;  %s1464_s2 = inlined_call_operand.vmem [shape: f32[1,256], index: 2, kind: input, shape index: {}]   ;;  %s1465_s3 = inlined_call_operand.hbm [shape: bf16[256,256], index: 3, kind: input, shape index: {}]   ;;  %s1466_s4 = inlined_call_operand.vmem [shape: f32[1,256], index: 4, kind: input, shape index: {}]   ;;  %s1467_s5 = inlined_call_operand.hbm [shape: bf16[256,256], index: 5, kind: input, shape index: {}]   ;;  %s1468_s6 = inlined_call_operand.vmem [shape: f32[1,256], index: 6, kind: input, shape index: {}]   ;;  %s1469_s7 = inlined_call_operand.vmem [shape: bf16[256,8], index: 7, kind: input, shape index: {}]   ;;  %s1470_s8 = inlined_call_operand.vmem [shape: f32[1,8], index: 8, kind: input, shape index: {}]   ;;  %s1471_s9 = inlined_call_operand.vmem [shape: f32[16,8], index: 9, kind: output, shape index: {}]  }
   0x1   :  { %s26_s11 = sshll.u32 %s1465_s3, 4  ;;  %s27_s11 = int_to_ptr.hbm [resolvable:$true] %s26_s11 }
   0x2   :  { %15 = vsyncpa [#allocation5], 0  ;;  %s1304_s12 = smov [#allocation2]   ;;  %s41_s16 = sshll.u32 %s1467_s5, 4  ;;  %s42_s16 = int_to_ptr.hbm [resolvable:$true] %s41_s16 }
   0x3   :  { %s28_s13 = sshll.u32 %s1304_s12, 4  ;;  %s1305_s17 = smov 128   ;;  %s29_s13 = int_to_ptr.vmem [resolvable:$true] %s28_s13 }
   0x4   :  { %s1306_s18 = smov 8   ;;  %s1307_s19 = smov [#allocation4]  }
   0x5   :  { %34 = dma.hbm_to_vmem [thread:$0]  %s27_s11, 4096, %s29_s13, [#allocation3], %s1305_s17, %s1305_s17, %s1306_s18  }
   0x6   :  { %s43_s20 = sshll.u32 %s1307_s19, 4  ;;  %s44_s20 = int_to_ptr.vmem [resolvable:$true] %s43_s20 }
   0x7   :  { %49 = dma.hbm_to_vmem [thread:$0]  %s42_s16, 4096, %s44_s20, [#allocation5], %s1305_s17, %s1305_s17, %s1306_s18  }
   0x8   :  { %1300 = dma.done.wait [#allocation3], 4096  }
   0x9   :  { %1301 = vsyncadd [#allocation3], 4294963200 }
   0xa   :  { %1302 = dma.done.wait [#allocation5], 4096  }
   0xb   :  { %1303 = vsyncadd [#allocation5], 4294963200  ;;  %v835_v0 = vld [vmem:[%s1463_s1 + $0x10] sm:$0xf]  ;;  %v1166_v1 = vld [vmem:[%s1463_s1 + $0x14] sm:$0xf0] }
   0xc   :  { %v1165_v2 = vld [vmem:[%s1463_s1 + $0x14] sm:$0xf]  ;;  %v836_v3 = vor.u32 %v1166_v1, %v835_v0  ;;  %v837_v4 = vld [vmem:[%s1463_s1 + $0x18] sm:$0xf0]  ;;  %v827_v5 = vld [vmem:[%s1463_s1] sm:$0xf] }
   0xd   :  { %v1164_v6 = vld [vmem:[%s1463_s1 + $0x4] sm:$0xf0]  ;;  %v840_v7 = vor.u32 %v1165_v2, %v837_v4  ;;  %v1163_v8 = vld [vmem:[%s1463_s1 + $0x4] sm:$0xf]  ;;  %v829_v9 = vld [vmem:[%s1463_s1 + $0x8] sm:$0xf0] }
   0xe   :  { %v65_v10 = vld [vmem:[%s1462_s0] sm:$0xff]  ;;  %108 = vmatpush.bf16.msra.mxu0 %v836_v3  ;;  %v828_v11 = vor.u32 %v1164_v6, %v827_v5  ;;  %v66_v12 = vld [vmem:[%s1462_s0 + $0x8] sm:$0xff]  ;;  %vm98_vm0 = vcmask 261120   ;;  %v901_v13 = vld [vmem:[#allocation2 + $0x70] sm:$0xf]  ;;  %v832_v15 = vor.u32 %v1163_v8, %v829_v9  ;;  %vm816_vm1 = vcmask 64512  }
   0xf   :  { %v1182_v14 = vld [vmem:[#allocation2 + $0x74] sm:$0xf0]  ;;  %122 = vmatpush.bf16.msra.mxu1 %v840_v7  ;;  %v965_v17 = vld [vmem:[#allocation2 + $0xf0] sm:$0xf]  ;;  %v1181_v19 = vld [vmem:[#allocation2 + $0x74] sm:$0xf]  ;;  %v67_v24 = vpack.c.bf16 %v66_v12, %v65_v10 }
  0x10   :  { %v902_v16 = vor.u32 %v1182_v14, %v901_v13  ;;  %v1198_v18 = vld [vmem:[#allocation2 + $0xf4] sm:$0xf0]  ;;  %v903_v21 = vld [vmem:[#allocation2 + $0x78] sm:$0xf0]  ;;  %v1197_v22 = vld [vmem:[#allocation2 + $0xf4] sm:$0xf] }
  0x11   :  { %v966_v20 = vor.u32 %v1198_v18, %v965_v17  ;;  %v967_v23 = vld [vmem:[#allocation2 + $0xf8] sm:$0xf0]  ;;  %v906_v25 = vor.u32 %v1181_v19, %v903_v21  ;;  %v893_v27 = vld [vmem:[#allocation2 + $0x60] sm:$0xf]  ;;  %v1180_v28 = vld [vmem:[#allocation2 + $0x64] sm:$0xf0] }
  0x12   :  { %334 = vmatpush.bf16.msra.mxu2 %v902_v16  ;;  %v970_v26 = vor.u32 %v1197_v22, %v967_v23  ;;  %v957_v29 = vld [vmem:[#allocation2 + $0xe0] sm:$0xf]  ;;  %109 = vmatpush.bf16.msra.mxu0 %v828_v11  ;;  %v894_v30 = vor.u32 %v1180_v28, %v893_v27  ;;  %v1196_v31 = vld [vmem:[#allocation2 + $0xe4] sm:$0xf0]  ;;  %v1179_v32 = vld [vmem:[#allocation2 + $0x64] sm:$0xf] }
  0x13   :  { %348 = vmatpush.bf16.msra.mxu3 %v966_v20  ;;  %v895_v33 = vld [vmem:[#allocation2 + $0x68] sm:$0xf0]  ;;  %123 = vmatpush.bf16.msra.mxu1 %v832_v15  ;;  %v958_v34 = vor.u32 %v1196_v31, %v957_v29  ;;  %v1195_v36 = vld [vmem:[#allocation2 + $0xe4] sm:$0xf]  ;;  %v885_v38 = vld [vmem:[#allocation2 + $0x50] sm:$0xf] }
  0x14   :  { %v898_v35 = vor.u32 %v1179_v32, %v895_v33  ;;  %v959_v37 = vld [vmem:[#allocation2 + $0xe8] sm:$0xf0]  ;;  %v1178_v40 = vld [vmem:[#allocation2 + $0x54] sm:$0xf0]  ;;  %v949_v41 = vld [vmem:[#allocation2 + $0xd0] sm:$0xf] }
  0x15   :  { %v962_v39 = vor.u32 %v1195_v36, %v959_v37  ;;  %v1194_v42 = vld [vmem:[#allocation2 + $0xd4] sm:$0xf0]  ;;  %841 = vmatmul.msk.bf16.vlgmr.msra.gmra.mxu0 %vm98_vm0, %v67_v24  ;;  %v886_v43 = vor.u32 %v1178_v40, %v885_v38  ;;  %v1177_v44 = vld [vmem:[#allocation2 + $0x54] sm:$0xf]  ;;  %v887_v45 = vld [vmem:[#allocation2 + $0x58] sm:$0xf0] }
  0x16   :  { %362 = vmatpush.bf16.msrb.mxu0 %v906_v25  ;;  %335 = vmatpush.bf16.msra.mxu2 %v894_v30  ;;  %v1193_v46 = vld [vmem:[#allocation2 + $0xd4] sm:$0xf]  ;;  %v950_v47 = vor.u32 %v1194_v42, %v949_v41  ;;  %v951_v48 = vld [vmem:[#allocation2 + $0xd8] sm:$0xf0]  ;;  %v877_v49 = vld [vmem:[#allocation2 + $0x40] sm:$0xf]  ;;  %v890_v51 = vor.u32 %v1177_v44, %v887_v45 }
  0x17   :  { %376 = vmatpush.bf16.msrb.mxu1 %v970_v26  ;;  %349 = vmatpush.bf16.msra.mxu3 %v958_v34  ;;  %v1176_v50 = vld [vmem:[#allocation2 + $0x44] sm:$0xf0]  ;;  %v941_v52 = vld [vmem:[#allocation2 + $0xc0] sm:$0xf]  ;;  %v954_v54 = vor.u32 %v1193_v46, %v951_v48  ;;  %v1175_v55 = vld [vmem:[#allocation2 + $0x44] sm:$0xf] }
  0x18   :  { %842 = vmatmul.msk.bf16.vlgmr.msra.gmra.mxu1 %vm98_vm0, %v67_v24  ;;  %v1192_v53 = vld [vmem:[#allocation2 + $0xc4] sm:$0xf0]  ;;  %v879_v56 = vld [vmem:[#allocation2 + $0x48] sm:$0xf0]  ;;  %v878_v57 = vor.u32 %v1176_v50, %v877_v49  ;;  %v1191_v58 = vld [vmem:[#allocation2 + $0xc4] sm:$0xf] }
  0x19   :  { %v943_v59 = vld [vmem:[#allocation2 + $0xc8] sm:$0xf0]  ;;  %v942_v60 = vor.u32 %v1192_v53, %v941_v52  ;;  %v882_v61 = vor.u32 %v1175_v55, %v879_v56  ;;  %v869_v63 = vld [vmem:[#allocation2 + $0x30] sm:$0xf]  ;;  %v1174_v0 = vld [vmem:[#allocation2 + $0x34] sm:$0xf0] }
  0x1a   :  { %363 = vmatpush.bf16.msrb.mxu0 %v898_v35  ;;  %336 = vmatpush.bf16.msra.mxu2 %v886_v43  ;;  %v946_v62 = vor.u32 %v1191_v58, %v943_v59  ;;  %v933_v1 = vld [vmem:[#allocation2 + $0xb0] sm:$0xf]  ;;  %v870_v2 = vor.u32 %v1174_v0, %v869_v63  ;;  %v1190_v3 = vld [vmem:[#allocation2 + $0xb4] sm:$0xf0]  ;;  %v1173_v4 = vld [vmem:[#allocation2 + $0x34] sm:$0xf] }
  0x1b   :  { %377 = vmatpush.bf16.msrb.mxu1 %v962_v39  ;;  %350 = vmatpush.bf16.msra.mxu3 %v950_v47  ;;  %v871_v5 = vld [vmem:[#allocation2 + $0x38] sm:$0xf0]  ;;  %v934_v6 = vor.u32 %v1190_v3, %v933_v1  ;;  %v1189_v8 = vld [vmem:[#allocation2 + $0xb4] sm:$0xf]  ;;  %v861_v11 = vld [vmem:[#allocation2 + $0x20] sm:$0xf] }
  0x1c   :  { %v874_v7 = vor.u32 %v1173_v4, %v871_v5  ;;  %v935_v9 = vld [vmem:[#allocation2 + $0xb8] sm:$0xf0]  ;;  %v1172_v12 = vld [vmem:[#allocation2 + $0x24] sm:$0xf0]  ;;  %v925_v14 = vld [vmem:[#allocation2 + $0xa0] sm:$0xf] }
  0x1d   :  { %v938_v10 = vor.u32 %v1189_v8, %v935_v9  ;;  %v862_v13 = vor.u32 %v1172_v12, %v861_v11  ;;  %v1188_v15 = vld [vmem:[#allocation2 + $0xa4] sm:$0xf0]  ;;  %v1171_v16 = vld [vmem:[#allocation2 + $0x24] sm:$0xf]  ;;  %v863_v18 = vld [vmem:[#allocation2 + $0x28] sm:$0xf0] }
  0x1e   :  { %364 = vmatpush.bf16.msrb.mxu0 %v890_v51  ;;  %337 = vmatpush.bf16.msra.mxu2 %v878_v57  ;;  %v926_v17 = vor.u32 %v1188_v15, %v925_v14  ;;  %v1187_v19 = vld [vmem:[#allocation2 + $0xa4] sm:$0xf]  ;;  %v927_v20 = vld [vmem:[#allocation2 + $0xa8] sm:$0xf0]  ;;  %v866_v21 = vor.u32 %v1171_v16, %v863_v18  ;;  %v853_v23 = vld [vmem:[#allocation2 + $0x10] sm:$0xf] }
  0x1f   :  { %378 = vmatpush.bf16.msrb.mxu1 %v954_v54  ;;  %351 = vmatpush.bf16.msra.mxu3 %v942_v60  ;;  %v930_v22 = vor.u32 %v1187_v19, %v927_v20  ;;  %v1170_v24 = vld [vmem:[#allocation2 + $0x14] sm:$0xf0]  ;;  %v917_v25 = vld [vmem:[#allocation2 + $0x90] sm:$0xf]  ;;  %v1169_v28 = vld [vmem:[#allocation2 + $0x14] sm:$0xf] }
  0x20   :  { %v854_v26 = vor.u32 %v1170_v24, %v853_v23  ;;  %v1186_v27 = vld [vmem:[#allocation2 + $0x94] sm:$0xf0]  ;;  %v855_v29 = vld [vmem:[#allocation2 + $0x18] sm:$0xf0]  ;;  %v1185_v32 = vld [vmem:[#allocation2 + $0x94] sm:$0xf] }
  0x21   :  { %v918_v30 = vor.u32 %v1186_v27, %v917_v25  ;;  %v858_v31 = vor.u32 %v1169_v28, %v855_v29  ;;  %v919_v33 = vld [vmem:[#allocation2 + $0x98] sm:$0xf0]  ;;  %v845_v35 = vld [vmem:[#allocation2] sm:$0xf]  ;;  %v1168_v36 = vld [vmem:[#allocation2 + $0x4] sm:$0xf0] }
  0x22   :  { %365 = vmatpush.bf16.msrb.mxu0 %v882_v61  ;;  %338 = vmatpush.bf16.msra.mxu2 %v870_v2  ;;  %v922_v34 = vor.u32 %v1185_v32, %v919_v33  ;;  %v909_v37 = vld [vmem:[#allocation2 + $0x80] sm:$0xf]  ;;  %v846_v38 = vor.u32 %v1168_v36, %v845_v35  ;;  %v1184_v39 = vld [vmem:[#allocation2 + $0x84] sm:$0xf0]  ;;  %v1167_v40 = vld [vmem:[#allocation2 + $0x4] sm:$0xf] }
  0x23   :  { %379 = vmatpush.bf16.msrb.mxu1 %v946_v62  ;;  %352 = vmatpush.bf16.msra.mxu3 %v934_v6  ;;  %v847_v41 = vld [vmem:[#allocation2 + $0x8] sm:$0xf0]  ;;  %v910_v42 = vor.u32 %v1184_v39, %v909_v37  ;;  %v1183_v44 = vld [vmem:[#allocation2 + $0x84] sm:$0xf]  ;;  %v1093_v47 = vld [vmem:[#allocation4 + $0xf0] sm:$0xf] }
  0x24   :  { %v850_v43 = vor.u32 %v1167_v40, %v847_v41  ;;  %v911_v45 = vld [vmem:[#allocation2 + $0x88] sm:$0xf0]  ;;  %v1230_v48 = vld [vmem:[#allocation4 + $0xf4] sm:$0xf0]  ;;  %v1229_v49 = vld [vmem:[#allocation4 + $0xf4] sm:$0xf] }
  0x25   :  { %v914_v46 = vor.u32 %v1183_v44, %v911_v45  ;;  %v1094_v50 = vor.u32 %v1230_v48, %v1093_v47  ;;  %v1095_v51 = vld [vmem:[#allocation4 + $0xf8] sm:$0xf0]  ;;  %v1085_v52 = vld [vmem:[#allocation4 + $0xe0] sm:$0xf]  ;;  %v1228_v53 = vld [vmem:[#allocation4 + $0xe4] sm:$0xf0] }
  0x26   :  { %366 = vmatpush.bf16.msrb.mxu0 %v874_v7  ;;  %339 = vmatpush.bf16.msra.mxu2 %v862_v13  ;;  %v1098_v54 = vor.u32 %v1229_v49, %v1095_v51  ;;  %v1227_v55 = vld [vmem:[#allocation4 + $0xe4] sm:$0xf]  ;;  %v1087_v56 = vld [vmem:[#allocation4 + $0xe8] sm:$0xf0]  ;;  %v1029_v57 = vld [vmem:[#allocation4 + $0x70] sm:$0xf]  ;;  %v1086_v58 = vor.u32 %v1228_v53, %v1085_v52 }
  0x27   :  { %380 = vmatpush.bf16.msrb.mxu1 %v938_v10  ;;  %353 = vmatpush.bf16.msra.mxu3 %v926_v17  ;;  %v1214_v59 = vld [vmem:[#allocation4 + $0x74] sm:$0xf0]  ;;  %v1213_v60 = vld [vmem:[#allocation4 + $0x74] sm:$0xf]  ;;  %v1031_v61 = vld [vmem:[#allocation4 + $0x78] sm:$0xf0]  ;;  %v1090_v62 = vor.u32 %v1227_v55, %v1087_v56 }
  0x28   :  { %v1030_v63 = vor.u32 %v1214_v59, %v1029_v57  ;;  %v1034_v0 = vor.u32 %v1213_v60, %v1031_v61  ;;  %v1077_v1 = vld [vmem:[#allocation4 + $0xd0] sm:$0xf]  ;;  %v1226_v2 = vld [vmem:[#allocation4 + $0xd4] sm:$0xf0]  ;;  %v1225_v3 = vld [vmem:[#allocation4 + $0xd4] sm:$0xf] }
  0x29   :  { %v1079_v4 = vld [vmem:[#allocation4 + $0xd8] sm:$0xf0]  ;;  %v1021_v5 = vld [vmem:[#allocation4 + $0x60] sm:$0xf]  ;;  %v1212_v6 = vld [vmem:[#allocation4 + $0x64] sm:$0xf0]  ;;  %v1078_v10 = vor.u32 %v1226_v2, %v1077_v1 }
  0x2a   :  { %367 = vmatpush.bf16.msrb.mxu0 %v866_v21  ;;  %340 = vmatpush.bf16.msra.mxu2 %v854_v26  ;;  %v1022_v7 = vor.u32 %v1212_v6, %v1021_v5  ;;  %v1211_v8 = vld [vmem:[#allocation4 + $0x64] sm:$0xf]  ;;  %v1023_v9 = vld [vmem:[#allocation4 + $0x68] sm:$0xf0]  ;;  %v1082_v12 = vor.u32 %v1225_v3, %v1079_v4  ;;  %v1069_v13 = vld [vmem:[#allocation4 + $0xc0] sm:$0xf] }
  0x2b   :  { %381 = vmatpush.bf16.msrb.mxu1 %v930_v22  ;;  %354 = vmatpush.bf16.msra.mxu3 %v918_v30  ;;  %v1026_v11 = vor.u32 %v1211_v8, %v1023_v9  ;;  %v1224_v14 = vld [vmem:[#allocation4 + $0xc4] sm:$0xf0]  ;;  %v1223_v15 = vld [vmem:[#allocation4 + $0xc4] sm:$0xf]  ;;  %v1071_v16 = vld [vmem:[#allocation4 + $0xc8] sm:$0xf0] }
  0x2c   :  { %v1070_v17 = vor.u32 %v1224_v14, %v1069_v13  ;;  %v1074_v18 = vor.u32 %v1223_v15, %v1071_v16  ;;  %v72_v19 = vld [vmem:[%s1464_s2] sm:$0x3]  ;;  %v1013_v36 = vld [vmem:[#allocation4 + $0x50] sm:$0xf]  ;;  %v1210_v37 = vld [vmem:[#allocation4 + $0x54] sm:$0xf0] }
  0x2d   :  { %v74_v22 = vperm.slane %v72_v19, 0  ;;  %v75_v23 = vperm.slane %v72_v19, 1  ;;  %v1014_v39 = vor.u32 %v1210_v37, %v1013_v36  ;;  %v1015_v40 = vld [vmem:[#allocation4 + $0x58] sm:$0xf0]  ;;  %v1221_v44 = vld [vmem:[#allocation4 + $0xb4] sm:$0xf] }
  0x2e   :  { %368 = vmatpush.bf16.msrb.mxu0 %v858_v31  ;;  %341 = vmatpush.bf16.msra.mxu2 %v846_v38  ;;  %v1209_v38 = vld [vmem:[#allocation4 + $0x54] sm:$0xf]  ;;  %v1005_v48 = vld [vmem:[#allocation4 + $0x40] sm:$0xf]  ;;  %v1208_v49 = vld [vmem:[#allocation4 + $0x44] sm:$0xf0] }
  0x2f   :  { %382 = vmatpush.bf16.msrb.mxu1 %v922_v34  ;;  %355 = vmatpush.bf16.msra.mxu3 %v910_v42  ;;  %v1018_v41 = vor.u32 %v1209_v38, %v1015_v40  ;;  %v1061_v42 = vld [vmem:[#allocation4 + $0xb0] sm:$0xf]  ;;  %v1006_v51 = vor.u32 %v1208_v49, %v1005_v48  ;;  %v1007_v52 = vld [vmem:[#allocation4 + $0x48] sm:$0xf0]  ;;  %v1220_v55 = vld [vmem:[#allocation4 + $0xa4] sm:$0xf0] }
  0x30   :  { %v1219_v56 = vld [vmem:[#allocation4 + $0xa4] sm:$0xf]  ;;  %v997_v60 = vld [vmem:[#allocation4 + $0x30] sm:$0xf]  ;;  %v1206_v61 = vld [vmem:[#allocation4 + $0x34] sm:$0xf0] }
  0x31   :  { %v1045_v2 = vld [vmem:[#allocation4 + $0x90] sm:$0xf]  ;;  %v1218_v3 = vld [vmem:[#allocation4 + $0x94] sm:$0xf0]  ;;  %v1217_v4 = vld [vmem:[#allocation4 + $0x94] sm:$0xf] }
  0x32   :  { %369 = vmatpush.bf16.msrb.mxu0 %v850_v43  ;;  %594 = vmatpush.bf16.msrb.mxu2 %v1030_v63  ;;  %v1222_v43 = vld [vmem:[#allocation4 + $0xb4] sm:$0xf0]  ;;  %v998_v63 = vor.u32 %v1206_v61, %v997_v60  ;;  %v1046_v5 = vor.u32 %v1218_v3, %v1045_v2  ;;  %v1047_v6 = vld [vmem:[#allocation4 + $0x98] sm:$0xf0]  ;;  %v989_v8 = vld [vmem:[#allocation4 + $0x20] sm:$0xf] }
  0x33   :  { %383 = vmatpush.bf16.msrb.mxu1 %v914_v46  ;;  %608 = vmatpush.bf16.msrb.mxu3 %v1094_v50  ;;  %v1062_v45 = vor.u32 %v1222_v43, %v1061_v42  ;;  %v1063_v46 = vld [vmem:[#allocation4 + $0xb8] sm:$0xf0]  ;;  %v1207_v50 = vld [vmem:[#allocation4 + $0x44] sm:$0xf]  ;;  %v1204_v9 = vld [vmem:[#allocation4 + $0x24] sm:$0xf0] }
  0x34   :  { %v1066_v47 = vor.u32 %v1221_v44, %v1063_v46  ;;  %v1010_v53 = vor.u32 %v1207_v50, %v1007_v52  ;;  %v1037_v14 = vld [vmem:[#allocation4 + $0x80] sm:$0xf]  ;;  %v1216_v15 = vld [vmem:[#allocation4 + $0x84] sm:$0xf0]  ;;  %v1215_v16 = vld [vmem:[#allocation4 + $0x84] sm:$0xf] }
  0x35   :  { %v1244_v60 = vld [vmem:[%s1469_s7 + $0x68] sm:$0xff]  ;;  %v1237_v61 = vld [vmem:[%s1469_s7 + $0x30] sm:$0xff]  ;;  %v1234_v3 = vld [vmem:[%s1469_s7 + $0x18] sm:$0xff] }
  0x36   :  { %622 = vmatpush.bf16.msra.mxu0 %v1034_v0  ;;  %595 = vmatpush.bf16.msrb.mxu2 %v1022_v7  ;;  %v999_v0 = vld [vmem:[#allocation4 + $0x38] sm:$0xf0]  ;;  %v1050_v7 = vor.u32 %v1217_v4, %v1047_v6  ;;  %v1241_v2 = vld [vmem:[%s1469_s7 + $0x50] sm:$0xff]  ;;  %v1240_v4 = vld [vmem:[%s1469_s7 + $0x48] sm:$0xff] }
  0x37   :  { %636 = vmatpush.bf16.msra.mxu1 %v1098_v54  ;;  %609 = vmatpush.bf16.msrb.mxu3 %v1086_v58  ;;  %v1053_v54 = vld [vmem:[#allocation4 + $0xa0] sm:$0xf]  ;;  %v1055_v58 = vld [vmem:[#allocation4 + $0xa8] sm:$0xf0] }
  0x38   :  { %v1054_v57 = vor.u32 %v1220_v55, %v1053_v54  ;;  %v1058_v59 = vor.u32 %v1219_v56, %v1055_v58  ;;  %v1239_v6 = vld [vmem:[%s1469_s7 + $0x40] sm:$0xff] }
  0x3a   :  { %623 = vmatpush.bf16.msra.mxu0 %v1026_v11  ;;  %596 = vmatpush.bf16.msrb.mxu2 %v1014_v39  ;;  %v990_v11 = vor.u32 %v1204_v9, %v989_v8  ;;  %v1231_v8 = vld [vmem:[%s1469_s7] sm:$0xff] }
  0x3b   :  { %637 = vmatpush.bf16.msra.mxu1 %v1090_v62  ;;  %610 = vmatpush.bf16.msrb.mxu3 %v1078_v10  ;;  %v1205_v62 = vld [vmem:[#allocation4 + $0x34] sm:$0xf]  ;;  %v1203_v10 = vld [vmem:[#allocation4 + $0x24] sm:$0xf]  ;;  %v428_v9 = vld [vmem:[%s1468_s6] sm:$0x3] }
  0x3c   :  { %v1002_v1 = vor.u32 %v1205_v62, %v999_v0  ;;  %v1243_v62 = vld [vmem:[%s1469_s7 + $0x60] sm:$0xff]  ;;  %v1242_v0 = vld [vmem:[%s1469_s7 + $0x58] sm:$0xff] }
  0x3e   :  { %624 = vmatpush.bf16.msra.mxu0 %v1018_v41  ;;  %597 = vmatpush.bf16.msrb.mxu2 %v1006_v51 }
  0x3f   :  { %638 = vmatpush.bf16.msra.mxu1 %v1082_v12  ;;  %611 = vmatpush.bf16.msrb.mxu3 %v1070_v17  ;;  %v991_v12 = vld [vmem:[#allocation4 + $0x28] sm:$0xf0]  ;;  %v1038_v17 = vor.u32 %v1216_v15, %v1037_v14 }
  0x40   :  { %v994_v13 = vor.u32 %v1203_v10, %v991_v12  ;;  %v431_v12 = vperm.slane %v428_v9, 1 }
  0x42   :  { %625 = vmatpush.bf16.msra.mxu0 %v1010_v53  ;;  %598 = vmatpush.bf16.msrb.mxu2 %v998_v63  ;;  %v1236_v63 = vld [vmem:[%s1469_s7 + $0x28] sm:$0xff] }
  0x43   :  { %639 = vmatpush.bf16.msra.mxu1 %v1074_v18  ;;  %612 = vmatpush.bf16.msrb.mxu3 %v1062_v45  ;;  %v1039_v18 = vld [vmem:[#allocation4 + $0x88] sm:$0xf0] }
  0x44   :  { %v1042_v19 = vor.u32 %v1215_v16, %v1039_v18  ;;  %v430_v16 = vperm.slane %v428_v9, 0 }
  0x46   :  { %626 = vmatpush.bf16.msra.mxu0 %v1002_v1  ;;  %599 = vmatpush.bf16.msrb.mxu2 %v990_v11  ;;  %v1235_v1 = vld [vmem:[%s1469_s7 + $0x20] sm:$0xff] }
  0x47   :  { %640 = vmatpush.bf16.msra.mxu1 %v1066_v47  ;;  %613 = vmatpush.bf16.msrb.mxu3 %v1054_v57 }
  0x4a   :  { %627 = vmatpush.bf16.msra.mxu0 %v994_v13 }
  0x4b   :  { %641 = vmatpush.bf16.msra.mxu1 %v1058_v59  ;;  %614 = vmatpush.bf16.msrb.mxu3 %v1046_v5  ;;  %v1233_v5 = vld [vmem:[%s1469_s7 + $0x10] sm:$0xff] }
  0x4f   :  { %642 = vmatpush.bf16.msra.mxu1 %v1050_v7  ;;  %615 = vmatpush.bf16.msrb.mxu3 %v1038_v17  ;;  %v1232_v7 = vld [vmem:[%s1469_s7 + $0x8] sm:$0xff] }
  0x53   :  { %643 = vmatpush.bf16.msra.mxu1 %v1042_v19 }
  0x92   :  { %v111_v20 = vpop.f32.mrf.mxu0 }
  0x93   :  { %v112_v24 = vadd.f32 %v111_v20, %v74_v22  ;;  %v981_v20 = vld [vmem:[#allocation4 + $0x10] sm:$0xf] }
  0x95   :  { %v125_v21 = vpop.f32.mrf.mxu1  ;;  %v130_v30 = vmax.f32 %v112_v24, 0.0  ;;  %v983_v24 = vld [vmem:[#allocation4 + $0x18] sm:$0xf0] }
  0x96   :  { %v126_v25 = vadd.f32 %v125_v21, %v75_v23  ;;  %v1202_v21 = vld [vmem:[#allocation4 + $0x14] sm:$0xf0] }
  0x98   :  { %v131_v32 = vmax.f32 %v126_v25, 0.0 }
  0x9a   :  { %v113_v26 = vpop.f32.mrf.mxu0 }
  0x9b   :  { %v114_v27 = vadd.f32 %v113_v26, %v74_v22  ;;  %v1201_v22 = vld [vmem:[#allocation4 + $0x14] sm:$0xf]  ;;  %v973_v26 = vld [vmem:[#allocation4] sm:$0xf] }
  0x9c   :  { %v986_v25 = vor.u32 %v1201_v22, %v983_v24 }
  0x9d   :  { %v127_v28 = vpop.f32.mrf.mxu1  ;;  %v132_v31 = vmax.f32 %v114_v27, 0.0  ;;  %v1200_v27 = vld [vmem:[#allocation4 + $0x4] sm:$0xf0] }
  0x9e   :  { %v128_v29 = vadd.f32 %v127_v28, %v75_v23  ;;  %v982_v23 = vor.u32 %v1202_v21, %v981_v20  ;;  %628 = vmatpush.bf16.msra.mxu0 %v986_v25  ;;  %v1199_v28 = vld [vmem:[#allocation4 + $0x4] sm:$0xf] }
  0x9f   :  { %v134_v34 = vpack.c.bf16 %v132_v31, %v130_v30  ;;  %v975_v30 = vld [vmem:[#allocation4 + $0x8] sm:$0xf0] }
  0xa0   :  { %v133_v33 = vmax.f32 %v128_v29, 0.0  ;;  %600 = vmatpush.bf16.msrb.mxu2 %v982_v23  ;;  %v974_v29 = vor.u32 %v1200_v27, %v973_v26  ;;  %v978_v31 = vor.u32 %v1199_v28, %v975_v30 }
  0xa1   :  { %342 = vmatmul.bf16.vlgmr.msra.gmra.mxu2 %v134_v34  ;;  %370 = vmatmul.bf16.vlgmr.msrb.gmra.mxu0 %v134_v34  ;;  %v1245_v34 = vld [vmem:[%s1469_s7 + $0x70] sm:$0xff] }
  0xa2   :  { %v135_v35 = vpack.c.bf16 %v133_v33, %v131_v32  ;;  %629 = vmatpush.bf16.msra.mxu0 %v978_v31  ;;  %v1246_v32 = vld [vmem:[%s1469_s7 + $0x78] sm:$0xff] }
  0xa3   :  { %v1238_v33 = vld [vmem:[%s1469_s7 + $0x38] sm:$0xff] }
  0xa4   :  { %356 = vmatmul.bf16.vlgmr.msra.gmra.mxu3 %v135_v35  ;;  %384 = vmatmul.bf16.vlgmr.msrb.gmra.mxu1 %v135_v35  ;;  %v168_v35 = vld [vmem:[%s1466_s4] sm:$0x3] }
  0xa5   :  { %601 = vmatpush.bf16.msrb.mxu2 %v974_v29  ;;  %802 = vmatpush.bf16.msra.mxu3 %v1246_v32  ;;  %v171_v37 = vperm.slane %v168_v35, 1  ;;  %v170_v41 = vperm.slane %v168_v35, 0 }
  0xa9   :  { %788 = vmatpush.bf16.msra.mxu2 %v1238_v33  ;;  %803 = vmatpush.bf16.msra.mxu3 %v1245_v34  ;;  %v1251_v34 = vld [vmem:[%s1470_s8] ss:$0 sm:$0xff] }
  0xad   :  { %804 = vmatpush.bf16.msra.mxu3 %v1244_v60  ;;  %789 = vmatpush.bf16.msra.mxu2 %v1237_v61 }
  0xb1   :  { %805 = vmatpush.bf16.msra.mxu3 %v1243_v62  ;;  %790 = vmatpush.bf16.msra.mxu2 %v1236_v63 }
  0xb5   :  { %806 = vmatpush.bf16.msra.mxu3 %v1242_v0  ;;  %791 = vmatpush.bf16.msra.mxu2 %v1235_v1 }
  0xb9   :  { %807 = vmatpush.bf16.msra.mxu3 %v1241_v2  ;;  %792 = vmatpush.bf16.msra.mxu2 %v1234_v3 }
  0xbd   :  { %808 = vmatpush.bf16.msra.mxu3 %v1240_v4  ;;  %793 = vmatpush.bf16.msra.mxu2 %v1233_v5 }
  0xc1   :  { %809 = vmatpush.bf16.msra.mxu3 %v1239_v6  ;;  %794 = vmatpush.bf16.msra.mxu2 %v1232_v7 }
  0xc5   :  { %795 = vmatpush.bf16.msra.mxu2 %v1231_v8 }
 0x11e   :  { %v371_v36 = vpop.f32.mrf.mxu0 }
 0x11f   :  { %v372_v39 = vadd.f32 %v371_v36, %v171_v37 }
 0x121   :  { %v385_v38 = vpop.f32.mrf.mxu1 }
 0x122   :  { %v386_v44 = vadd.f32 %v385_v38, %v372_v39 }
 0x124   :  { %v343_v40 = vpop.f32.mrf.mxu2  ;;  %v391_v49 = vmax.f32 %v386_v44, 0.0 }
 0x125   :  { %v344_v47 = vadd.f32 %v343_v40, %v170_v41 }
 0x126   :  { %v373_v43 = vpop.f32.mrf.mxu0 }
 0x127   :  { %v357_v42 = vpop.f32.mrf.mxu3  ;;  %v374_v45 = vadd.f32 %v373_v43, %v171_v37 }
 0x128   :  { %v358_v52 = vadd.f32 %v357_v42, %v344_v47 }
 0x129   :  { %v387_v46 = vpop.f32.mrf.mxu1 }
 0x12a   :  { %v388_v48 = vadd.f32 %v387_v46, %v374_v45  ;;  %v390_v57 = vmax.f32 %v358_v52, 0.0 }
 0x12c   :  { %v393_v50 = vmax.f32 %v388_v48, 0.0  ;;  %v345_v51 = vpop.f32.mrf.mxu2 }
 0x12d   :  { %v346_v54 = vadd.f32 %v345_v51, %v170_v41 }
 0x12e   :  { %v395_v53 = vpack.c.bf16 %v393_v50, %v391_v49 }
 0x12f   :  { %v359_v55 = vpop.f32.mrf.mxu3 }
 0x130   :  { %v360_v56 = vadd.f32 %v359_v55, %v346_v54  ;;  %616 = vmatmul.bf16.vlgmr.msrb.gmra.mxu3 %v395_v53  ;;  %644 = vmatmul.bf16.vlgmr.msra.gmra.mxu1 %v395_v53 }
 0x132   :  { %v392_v58 = vmax.f32 %v360_v56, 0.0 }
 0x134   :  { %v394_v59 = vpack.c.bf16 %v392_v58, %v390_v57 }
 0x136   :  { %602 = vmatmul.bf16.vlgmr.msrb.gmra.mxu2 %v394_v59  ;;  %630 = vmatmul.bf16.vlgmr.msra.gmra.mxu0 %v394_v59 }
 0x1ad   :  { %v645_v10 = vpop.f32.mrf.mxu1 }
 0x1b3   :  { %v631_v11 = vpop.f32.mrf.mxu0  ;;  %v617_v14 = vpop.f32.mrf.mxu3 }
 0x1b4   :  { %v632_v13 = vadd.f32 %v631_v11, %v431_v12 }
 0x1b5   :  { %v647_v20 = vpop.f32.mrf.mxu1 }
 0x1b6   :  { %v646_v18 = vadd.f32 %v645_v10, %v632_v13 }
 0x1b8   :  { %v651_v23 = vmax.f32 %v646_v18, 0.0 }
 0x1b9   :  { %v603_v15 = vpop.f32.mrf.mxu2 }
 0x1ba   :  { %v604_v21 = vadd.f32 %v603_v15, %v430_v16 }
 0x1bb   :  { %v633_v17 = vpop.f32.mrf.mxu0  ;;  %v619_v29 = vpop.f32.mrf.mxu3 }
 0x1bc   :  { %v634_v19 = vadd.f32 %v633_v17, %v431_v12  ;;  %v618_v26 = vadd.f32 %v617_v14, %v604_v21 }
 0x1be   :  { %v648_v22 = vadd.f32 %v647_v20, %v634_v19  ;;  %v650_v31 = vmax.f32 %v618_v26, 0.0 }
 0x1c0   :  { %v653_v24 = vmax.f32 %v648_v22, 0.0 }
 0x1c1   :  { %v605_v25 = vpop.f32.mrf.mxu2 }
 0x1c2   :  { %v655_v27 = vpack.c.bf16 %v653_v24, %v651_v23  ;;  %v606_v28 = vadd.f32 %v605_v25, %v430_v16 }
 0x1c4   :  { %v620_v30 = vadd.f32 %v619_v29, %v606_v28  ;;  %810 = vmatmul.bf16.vlgmr.msra.gmra.mxu3 %v655_v27 }
 0x1c6   :  { %v652_v32 = vmax.f32 %v620_v30, 0.0 }
 0x1c8   :  { %v654_v33 = vpack.c.bf16 %v652_v32, %v650_v31 }
 0x1ca   :  { %796 = vmatmul.bf16.vlgmr.msra.gmra.mxu2 %v654_v33 }
 0x247   :  { %v811_v35 = vpop.f32.mrf.mxu3 }
 0x24d   :  { %v797_v36 = vpop.f32.mrf.mxu2 }
 0x24e   :  { %v798_v37 = vadd.f32 %v1251_v34, %v797_v36 }
 0x24f   :  { %v813_v41 = vpop.f32.mrf.mxu3 }
 0x250   :  { %v812_v38 = vadd.f32 %v811_v35, %v798_v37 }
 0x252   :  { %817 = vst.msk [vmem:[%s1471_s9] sm:$0xff] %vm816_vm1, %v812_v38 }
 0x255   :  { %v799_v39 = vpop.f32.mrf.mxu2 }
 0x256   :  { %v800_v40 = vadd.f32 %v1251_v34, %v799_v39 }
 0x258   :  { %v814_v42 = vadd.f32 %v813_v41, %v800_v40 }
 0x25a   :  { %818 = vst.msk [vmem:[%s1471_s9 + $0x8] sm:$0xff] %vm816_vm1, %v814_v42 }
 0x25b   :  { %823 = vsyncpa [#allocation3], 1 }
 0x25c   :  { %824 = vsyncpa [#allocation5], 1 }

</bundles_post_ra>
